<compile_context>
chip_gen: v6e
topology: v6e:2x2x1
jax: 0.10.0
libtpu: 0.0.40
codegen_flags: <defaults>
</compile_context>

<pallas_src>
import jax
import jax.numpy as jnp
from jax.experimental import pallas as pl
from jax.experimental.pallas import tpu as pltpu


def _round_up(n, m):
    return ((n + m - 1) // m) * m


def pasnet_kernel(x_ref, w1_ref, b1_ref, w2_ref, b2_ref, w3_ref, b3_ref, o_ref):
    # Layer 1 (pathway mask pre-folded into w1; do_m1 == ones elided).
    # bf16 inputs feed the MXU at native rate; accumulate in f32.
    z1 = jnp.dot(x_ref[...].astype(jnp.bfloat16), w1_ref[...],
                 preferred_element_type=jnp.float32) + b1_ref[...]
    h1 = jax.nn.sigmoid(z1)                       # f32 on VPU/EUP

    # Layer 2 (do_m2 == ones elided).
    z2 = jnp.dot(h1.astype(jnp.bfloat16), w2_ref[...],
                 preferred_element_type=jnp.float32) + b2_ref[...]
    h2 = jax.nn.sigmoid(z2)

    # Layer 3 + softmax over the feature axis (all f32).
    logits = jnp.dot(h2.astype(jnp.bfloat16), w3_ref[...],
                     preferred_element_type=jnp.float32) + b3_ref[...]
    m = jnp.max(logits, axis=-1, keepdims=True)
    e = jnp.exp(logits - m)
    denom = jnp.sum(e, axis=-1, keepdims=True)
    # Exact division -> rows sum to 1 (approx reciprocal broke this before).
    o_ref[...] = (e / denom).astype(o_ref.dtype)


def _resident(shape):
    # Weights/biases never change block index across the grid: keep them
    # VMEM-resident and single-buffered (default pipelining would double-buffer
    # them for no benefit). Fall back cleanly if Buffered(1) is not accepted.
    try:
        return pl.BlockSpec(shape, lambda i: (0, 0), pipeline_mode=pl.Buffered(1))
    except Exception:
        return pl.BlockSpec(shape, lambda i: (0, 0))


def pasnet_forward(x, params):
    w1, b1, w2, b2, w3, b3, mask = params
    B, In = x.shape
    P = w1.shape[1]
    H = w2.shape[1]
    O = w3.shape[1]

    # Fold the constant pathway mask into w1 once; weights go to bf16 for the
    # MXU (halves their HBM DMA and VMEM footprint). Biases stay f32.
    w1m = (w1 * mask).astype(jnp.bfloat16)
    w2b = w2.astype(jnp.bfloat16)
    w3b = w3.astype(jnp.bfloat16)
    b1f = b1.astype(jnp.float32)
    b2f = b2.astype(jnp.float32)
    b3f = b3.astype(jnp.float32)
    xf = x.astype(jnp.float32)          # x stays f32 in HBM; cast at the dot

    # Batch tile: 256 feeds the 2x256 MXU on v6e/v7x when the batch is large;
    # 128 otherwise; tiny batches use a single full-batch block (rows are
    # independent, so a ragged last tile only produces garbage in rows that
    # Pallas never writes back).
    if B >= 256:
        TB = 256
    elif B >= 8:
        TB = min(128, _round_up(B, 8))
    else:
        TB = B
    grid = (pl.cdiv(B, TB),)

    # VMEM budget: single-buffered bf16 weights + f32 biases, double-buffered
    # x/out tiles, in-kernel f32 temporaries, plus headroom. Cap at 7/8 of the
    # per-core VMEM capacity (56 MiB on v7x) - never request more than exists.
    weight_bytes = 2 * (In * P + P * H + H * O)
    bias_bytes = 4 * (P + H + O)
    io_tile_bytes = 4 * TB * (In + O)
    temp_bytes = 4 * TB * (P + H + 2 * O)
    computed = weight_bytes + bias_bytes + 2 * io_tile_bytes + temp_bytes + (4 << 20)
    try:
        vmem_cap = int(pltpu.get_tpu_info().vmem_capacity_bytes)
    except Exception:
        vmem_cap = 64 * 1024 * 1024
    vmem_limit = int(min(max(computed, 32 * 1024 * 1024), (vmem_cap * 7) // 8))

    cost = pl.CostEstimate(
        flops=2 * B * (In * P + P * H + H * O),
        transcendentals=B * (P + H + O),
        bytes_accessed=weight_bytes + bias_bytes + 4 * B * (In + O),
    )

    # No feature-dim padding: every block's trailing dims equal the full array
    # dims, which satisfies the (8,128) BlockSpec rule at any PASNet size.
    return pl.pallas_call(
        pasnet_kernel,
        out_shape=jax.ShapeDtypeStruct((B, O), jnp.float32),
        grid=grid,
        in_specs=[
            pl.BlockSpec((TB, In), lambda i: (i, 0)),   # x: batch-tiled, pipelined
            _resident((In, P)),                         # w1 (mask folded, bf16)
            _resident((1, P)),                          # b1 (f32)
            _resident((P, H)),                          # w2 (bf16)
            _resident((1, H)),                          # b2 (f32)
            _resident((H, O)),                          # w3 (bf16)
            _resident((1, O)),                          # b3 (f32)
        ],
        out_specs=pl.BlockSpec((TB, O), lambda i: (i, 0)),
        compiler_params=pltpu.CompilerParams(
            dimension_semantics=("parallel",),          # batch tiles across TCs (v7x)
            vmem_limit_bytes=vmem_limit,
        ),
        cost_estimate=cost,
    )(xf, w1m, b1f, w2b, b2f, w3b, b3f)


def make_params(key, in_nodes, pathway_nodes, hidden_nodes, out_nodes):
    ks = jax.random.split(key, 7)

    def linear_init(kw, kb, fan_in, fan_out):
        bound = 1.0 / jnp.sqrt(fan_in)
        w = jax.random.uniform(kw, (fan_in, fan_out), jnp.float32, -bound, bound)
        b = jax.random.uniform(kb, (1, fan_out), jnp.float32, -bound, bound)
        return w, b

    w1, b1 = linear_init(ks[0], ks[1], in_nodes, pathway_nodes)
    w2, b2 = linear_init(ks[2], ks[3], pathway_nodes, hidden_nodes)
    w3, b3 = linear_init(ks[4], ks[5], hidden_nodes, out_nodes)

    # Deterministic binary pathway mask, stored [In_Nodes, Pathway_Nodes].
    mask = (jax.random.uniform(ks[6], (in_nodes, pathway_nodes)) > 0.5).astype(jnp.float32)

    # do_m1 / do_m2 are all-ones in the reference module -> not materialized.
    return (w1, b1, w2, b2, w3, b3, mask)


def reference_forward(x, params):
    # Pure-JAX f32 reference mirroring the PyTorch forward
    # (usePathwaydata=True, training=True with all-ones do_m1/do_m2).
    w1, b1, w2, b2, w3, b3, mask = params
    h1 = jax.nn.sigmoid(x @ (w1 * mask) + b1)
    h2 = jax.nn.sigmoid(h1 @ w2 + b2)
    return jax.nn.softmax(h2 @ w3 + b3, axis=1)


def reference_forward_bf16(x, params):
    # Same math, but mirroring the kernel's dtype policy (bf16 at the MXU,
    # f32 accumulate / elementwise) for a tight numerical comparison.
    w1, b1, w2, b2, w3, b3, mask = params

    def dot(a, b):
        return jnp.dot(a.astype(jnp.bfloat16), b.astype(jnp.bfloat16),
                       preferred_element_type=jnp.float32)

    h1 = jax.nn.sigmoid(dot(x, w1 * mask) + b1)
    h2 = jax.nn.sigmoid(dot(h1, w2) + b2)
    return jax.nn.softmax(dot(h2, w3) + b3, axis=1)


if __name__ == "__main__":
    B, In_Nodes, Pathway_Nodes, Hidden_Nodes, Out_Nodes = 8, 32, 64, 32, 8

    key = jax.random.PRNGKey(0)
    kx, kp = jax.random.split(key)
    x = jax.random.normal(kx, (B, In_Nodes), jnp.float32)
    params = make_params(kp, In_Nodes, Pathway_Nodes, Hidden_Nodes, Out_Nodes)

    out = pasnet_forward(x, params)
    jax.block_until_ready(out)

    assert out.shape == (B, Out_Nodes)
    # Exact softmax normalization (exact division, no approx reciprocal).
    assert jnp.allclose(jnp.sum(out, axis=1), 1.0, atol=1e-5)
    # Tight check against a reference that uses the same bf16-at-the-MXU policy.
    ref_bf16 = reference_forward_bf16(x, params)
    assert jnp.allclose(out, ref_bf16, atol=1e-4, rtol=1e-4)
    # Looser check against the pure-f32 PyTorch-equivalent forward
    # (difference is only bf16 rounding of the matmul inputs).
    ref_f32 = reference_forward(x, params)
    assert jnp.allclose(out, ref_f32, atol=5e-3, rtol=5e-3)

    print("KERNEL_OK")
</pallas_src>

<mosaic_0001>
module attributes {stable_mosaic.version = 11 : i64} {
  func.func @pasnet_kernel(%arg0: i32, %arg1: memref<8x32xf32, #tpu.memory_space<vmem>>, %arg2: memref<32x64xbf16, #tpu.memory_space<vmem>>, %arg3: memref<1x64xf32, #tpu.memory_space<vmem>>, %arg4: memref<64x32xbf16, #tpu.memory_space<vmem>>, %arg5: memref<1x32xf32, #tpu.memory_space<vmem>>, %arg6: memref<32x8xbf16, #tpu.memory_space<vmem>>, %arg7: memref<1x8xf32, #tpu.memory_space<vmem>>, %arg8: memref<8x8xf32, #tpu.memory_space<vmem>>) attributes {dimension_semantics = [#tpu.dimension_semantics<parallel>], iteration_bounds = array<i64: 1>, scalar_prefetch = 0 : i64, scratch_operands = 0 : i64, tpu.core_type = #tpu.core_type<tc>, window_params = [{transform_indices = @transform_0, window_bounds = array<i64: 8, 32>}, {pipeline_mode = #tpu.pipeline_mode<synchronous>, transform_indices = @transform_1, window_bounds = array<i64: 32, 64>}, {pipeline_mode = #tpu.pipeline_mode<synchronous>, transform_indices = @transform_2, window_bounds = array<i64: 1, 64>}, {pipeline_mode = #tpu.pipeline_mode<synchronous>, transform_indices = @transform_3, window_bounds = array<i64: 64, 32>}, {pipeline_mode = #tpu.pipeline_mode<synchronous>, transform_indices = @transform_4, window_bounds = array<i64: 1, 32>}, {pipeline_mode = #tpu.pipeline_mode<synchronous>, transform_indices = @transform_5, window_bounds = array<i64: 32, 8>}, {pipeline_mode = #tpu.pipeline_mode<synchronous>, transform_indices = @transform_6, window_bounds = array<i64: 1, 8>}, {transform_indices = @transform_7, window_bounds = array<i64: 8, 8>}]} {
    %c0 = arith.constant 0 : index
    %c0_0 = arith.constant 0 : index
    %0 = vector.load %arg1[%c0, %c0_0] : memref<8x32xf32, #tpu.memory_space<vmem>>, vector<8x32xf32>
    %1 = arith.truncf %0 : vector<8x32xf32> to vector<8x32xbf16>
    %c0_1 = arith.constant 0 : index
    %c0_2 = arith.constant 0 : index
    %2 = vector.load %arg2[%c0_1, %c0_2] : memref<32x64xbf16, #tpu.memory_space<vmem>>, vector<32x64xbf16>
    %cst = arith.constant dense<0.000000e+00> : vector<8x64xf32>
    %3 = tpu.matmul %1, %2, %cst {dimension_numbers = #tpu.dot_dimension_numbers<[1], [0], [0], [1], [0, 0, 1, 1], [], []>} : vector<8x32xbf16>, vector<32x64xbf16>, vector<8x64xf32> -> vector<8x64xf32>
    %c0_3 = arith.constant 0 : index
    %c0_4 = arith.constant 0 : index
    %4 = vector.load %arg3[%c0_3, %c0_4] : memref<1x64xf32, #tpu.memory_space<vmem>>, vector<1x64xf32>
    %5 = vector.broadcast %4 : vector<1x64xf32> to vector<8x64xf32>
    %6 = arith.addf %3, %5 : vector<8x64xf32>
    %7 = arith.negf %6 : vector<8x64xf32>
    %8 = math.exp %7 : vector<8x64xf32>
    %cst_5 = arith.constant 1.000000e+00 : f32
    %9 = vector.broadcast %cst_5 : f32 to vector<8x64xf32>
    %10 = arith.addf %9, %8 : vector<8x64xf32>
    %11 = arith.divf %9, %10 : vector<8x64xf32>
    %12 = arith.truncf %11 : vector<8x64xf32> to vector<8x64xbf16>
    %c0_6 = arith.constant 0 : index
    %c0_7 = arith.constant 0 : index
    %13 = vector.load %arg4[%c0_6, %c0_7] : memref<64x32xbf16, #tpu.memory_space<vmem>>, vector<64x32xbf16>
    %cst_8 = arith.constant dense<0.000000e+00> : vector<8x32xf32>
    %14 = tpu.matmul %12, %13, %cst_8 {dimension_numbers = #tpu.dot_dimension_numbers<[1], [0], [0], [1], [0, 0, 1, 1], [], []>} : vector<8x64xbf16>, vector<64x32xbf16>, vector<8x32xf32> -> vector<8x32xf32>
    %c0_9 = arith.constant 0 : index
    %c0_10 = arith.constant 0 : index
    %15 = vector.load %arg5[%c0_9, %c0_10] : memref<1x32xf32, #tpu.memory_space<vmem>>, vector<1x32xf32>
    %16 = vector.broadcast %15 : vector<1x32xf32> to vector<8x32xf32>
    %17 = arith.addf %14, %16 : vector<8x32xf32>
    %18 = arith.negf %17 : vector<8x32xf32>
    %19 = math.exp %18 : vector<8x32xf32>
    %cst_11 = arith.constant 1.000000e+00 : f32
    %20 = vector.broadcast %cst_11 : f32 to vector<8x32xf32>
    %21 = arith.addf %20, %19 : vector<8x32xf32>
    %22 = arith.divf %20, %21 : vector<8x32xf32>
    %23 = arith.truncf %22 : vector<8x32xf32> to vector<8x32xbf16>
    %c0_12 = arith.constant 0 : index
    %c0_13 = arith.constant 0 : index
    %24 = vector.load %arg6[%c0_12, %c0_13] : memref<32x8xbf16, #tpu.memory_space<vmem>>, vector<32x8xbf16>
    %cst_14 = arith.constant dense<0.000000e+00> : vector<8x8xf32>
    %25 = tpu.matmul %23, %24, %cst_14 {dimension_numbers = #tpu.dot_dimension_numbers<[1], [0], [0], [1], [0, 0, 1, 1], [], []>} : vector<8x32xbf16>, vector<32x8xbf16>, vector<8x8xf32> -> vector<8x8xf32>
    %c0_15 = arith.constant 0 : index
    %c0_16 = arith.constant 0 : index
    %26 = vector.load %arg7[%c0_15, %c0_16] : memref<1x8xf32, #tpu.memory_space<vmem>>, vector<1x8xf32>
    %27 = vector.broadcast %26 : vector<1x8xf32> to vector<8x8xf32>
    %28 = arith.addf %25, %27 : vector<8x8xf32>
    %cst_17 = arith.constant dense<0xFF800000> : vector<8xf32>
    %29 = vector.multi_reduction <maximumf>, %28, %cst_17 [1] : vector<8x8xf32> to vector<8xf32>
    %30 = vector.shape_cast %29 : vector<8xf32> to vector<8x1xf32>
    %31 = vector.broadcast %30 : vector<8x1xf32> to vector<8x8xf32>
    %32 = arith.subf %28, %31 : vector<8x8xf32>
    %33 = math.exp %32 : vector<8x8xf32>
    %cst_18 = arith.constant dense<0.000000e+00> : vector<8xf32>
    %34 = vector.multi_reduction <add>, %33, %cst_18 [1] : vector<8x8xf32> to vector<8xf32>
    %35 = vector.shape_cast %34 : vector<8xf32> to vector<8x1xf32>
    %36 = vector.broadcast %35 : vector<8x1xf32> to vector<8x8xf32>
    %37 = arith.divf %33, %36 : vector<8x8xf32>
    %c0_19 = arith.constant 0 : index
    %c0_20 = arith.constant 0 : index
    %38 = vector.load %arg8[%c0_19, %c0_20] : memref<8x8xf32, #tpu.memory_space<vmem>>, vector<8x8xf32>
    tpu.vector_store %arg8[%c0_19, %c0_20], %37 {strides = array<i32>} : memref<8x8xf32, #tpu.memory_space<vmem>>, vector<8x8xf32>,
    return
  }
  func.func @transform_0(%arg0: i32) -> (i32, i32) {
    %c0_i32 = arith.constant 0 : i32
    %c0_i32_0 = arith.constant 0 : i32
    return %arg0, %c0_i32 : i32, i32
  }
  func.func @transform_1(%arg0: i32) -> (i32, i32) {
    %c0_i32 = arith.constant 0 : i32
    %c0_i32_0 = arith.constant 0 : i32
    %c0_i32_1 = arith.constant 0 : i32
    return %c0_i32, %c0_i32_0 : i32, i32
  }
  func.func @transform_2(%arg0: i32) -> (i32, i32) {
    %c0_i32 = arith.constant 0 : i32
    %c0_i32_0 = arith.constant 0 : i32
    %c0_i32_1 = arith.constant 0 : i32
    return %c0_i32, %c0_i32_0 : i32, i32
  }
  func.func @transform_3(%arg0: i32) -> (i32, i32) {
    %c0_i32 = arith.constant 0 : i32
    %c0_i32_0 = arith.constant 0 : i32
    %c0_i32_1 = arith.constant 0 : i32
    return %c0_i32, %c0_i32_0 : i32, i32
  }
  func.func @transform_4(%arg0: i32) -> (i32, i32) {
    %c0_i32 = arith.constant 0 : i32
    %c0_i32_0 = arith.constant 0 : i32
    %c0_i32_1 = arith.constant 0 : i32
    return %c0_i32, %c0_i32_0 : i32, i32
  }
  func.func @transform_5(%arg0: i32) -> (i32, i32) {
    %c0_i32 = arith.constant 0 : i32
    %c0_i32_0 = arith.constant 0 : i32
    %c0_i32_1 = arith.constant 0 : i32
    return %c0_i32, %c0_i32_0 : i32, i32
  }
  func.func @transform_6(%arg0: i32) -> (i32, i32) {
    %c0_i32 = arith.constant 0 : i32
    %c0_i32_0 = arith.constant 0 : i32
    %c0_i32_1 = arith.constant 0 : i32
    return %c0_i32, %c0_i32_0 : i32, i32
  }
  func.func @transform_7(%arg0: i32) -> (i32, i32) {
    %c0_i32 = arith.constant 0 : i32
    %c0_i32_0 = arith.constant 0 : i32
    return %arg0, %c0_i32 : i32, i32
  }
}

</mosaic_0001>

<bundles_post_ra>
// kernel: tpu_custom_call.1
= control target key start
LH: loop header
LB: loop body
LE: loop exit
PB: predicated region body
PF: predicated region fallthrough
CT: control target
= control target key end

     0   :  { %v387_v1 = vmov 0.0   ;;  %vm388_vm0 = vmmov 0   ;;  %vm53_vm1 = vcmask 261120   ;;  %s474_s0 = inlined_call_operand.vmem [shape: f32[8,32], index: 0, kind: input, shape index: {}]   ;;  %s475_s1 = inlined_call_operand.vmem [shape: bf16[32,64], index: 1, kind: input, shape index: {}]   ;;  %s476_s2 = inlined_call_operand.vmem [shape: f32[1,64], index: 2, kind: input, shape index: {}]   ;;  %s477_s3 = inlined_call_operand.vmem [shape: bf16[64,32], index: 3, kind: input, shape index: {}]   ;;  %s478_s4 = inlined_call_operand.vmem [shape: f32[1,32], index: 4, kind: input, shape index: {}]   ;;  %s479_s5 = inlined_call_operand.vmem [shape: bf16[32,8], index: 5, kind: input, shape index: {}]   ;;  %s480_s6 = inlined_call_operand.vmem [shape: f32[1,8], index: 6, kind: input, shape index: {}]   ;;  %s481_s7 = inlined_call_operand.hbm [shape: f32[8,8], index: 7, kind: output, shape index: {}]  }
   0x1   :  { %v345_v0 = vld [vmem:[%s475_s1 + $0x8] sm:$0xff]   ;;  %314 = vmatprep.subr.bf16.mxu0 %v387_v1  ;;  %322 = vmatprep.subr.bf16.mxu1 %v387_v1  ;;  %v346_v2 = vld [vmem:[%s475_s1] sm:$0xff]  }
   0x2   :  { %315 = vmatpush3.bf16.msra.mxu0 %v345_v0  ;;  %318 = vmatprep.mubr.msk.bf16.mxu0 %vm388_vm0, %v387_v1  ;;  %v28_v3 = vld [vmem:[%s474_s0] sm:$0xff] }
   0x3   :  { %316 = vmatprep.subr.bf16.mxu0 %v387_v1  ;;  %330 = vmatprep.mubr.msk.bf16.mxu1 %vm388_vm0, %v387_v1  ;;  %v29_v4 = vpack.c.bf16 %v28_v3, %v28_v3 }
   0x6   :  { %317 = vmatpush3.bf16.msra.mxu0 %v346_v2 }
   0x7   :  { %12 = vsyncpa [#allocation3], 0  ;;  %334 = vmatprep.subr.bf16.mxu0 %v387_v1  ;;  %v347_v5 = vld [vmem:[%s477_s3 + $0x18] sm:$0xff]   ;;  %v348_v6 = vld [vmem:[%s477_s3 + $0x10] sm:$0xff]   ;;  %vm143_vm2 = vcmask 523264   ;;  %vm260_vm3 = vcmask 64512  }
   0x8   :  { %323 = vmatpush3.bf16.msra.mxu1 %v347_v5  ;;  %v349_v7 = vld [vmem:[%s477_s3 + $0x8] sm:$0xff]   ;;  %v350_v8 = vld [vmem:[%s477_s3] sm:$0xff]  }
   0x9   :  { %319 = vmatmul.mubr.msk.bf16.vlgmr.msra.gmra.mxu0 %vm53_vm1, %v29_v4  ;;  %324 = vmatprep.subr.bf16.mxu1 %v387_v1  ;;  %v287_v9 = vld [vmem:[%s476_s2] ss:$0 sm:$0xff]  ;;  %v351_v20 = vld [vmem:[%s479_s5 + $0x8] sm:$0xff]  }
   0xa   :  { %338 = vmatprep.mubr.msk.bf16.mxu0 %vm388_vm0, %v387_v1  ;;  %335 = vmatpush3.bf16.msra.mxu0 %v351_v20  ;;  %v352_v21 = vld [vmem:[%s479_s5] sm:$0xff]  }
   0xb   :  { %336 = vmatprep.subr.bf16.mxu0 %v387_v1  ;;  %v292_v22 = vld [vmem:[%s478_s4] ss:$0 sm:$0xff]  ;;  %s389_s4 = smov [#allocation2]  }
   0xc   :  { %325 = vmatpush3.bf16.msra.mxu1 %v348_v6  ;;  %v299_v33 = vld [vmem:[%s480_s6] ss:$0 sm:$0xff]  ;;  %s279_s6 = sshll.u32 %s389_s4, 4  ;;  %s280_s6 = int_to_ptr.vmem [resolvable:$true] %s279_s6 }
   0xd   :  { %326 = vmatprep.subr.bf16.mxu1 %v387_v1  ;;  %s365_s20 = scalar_lea.vmem %s280_s6, 128  ;;  %p370_p1 = scmp.lt.s32.totalorder %s280_s6, %s280_s6 }
   0xe   :  { %337 = vmatpush3.bf16.msra.mxu0 %v352_v21  ;;  %p366_p0 = scmp.ne.s32.totalorder %s280_s6, %s365_s20  ;;  %p371_p2 = scmp.lt.s32.totalorder %s365_s20, %s365_s20 }
  0x10   :  { %327 = vmatpush3.bf16.msra.mxu1 %v349_v7  ;;  %p372_p3 = por %p371_p2, %p370_p1 }
  0x11   :  { %328 = vmatprep.subr.bf16.mxu1 %v387_v1 }
  0x12   :  { %p373_p4 = pnand %p372_p3, %p366_p0 }
  0x14   :  { %329 = vmatpush3.bf16.msra.mxu1 %v350_v8 }
  0xc9   :  { %v91_v10 = vpop.f32.mrf.mxu0 }
  0xca   :  { %v92_v11 = vadd.f32 %v287_v9, %v91_v10 }
  0xcb   :  { %v320_v12 = vpop.f32.mrf.mxu0 }
  0xcc   :  { %v291_v13 = vmul.f32 -1.442695, %v92_v11 }
  0xcd   :  { %v94_v14 = vpop.f32.mrf.mxu0 }
  0xce   :  { %353 = vpow2.f32 %v291_v13 }
  0xcf   :  { %v321_v15 = vpop.f32.mrf.mxu0 }
  0xdb   :  { %v354_v16 = vpop.eup %353 }
  0xdc   :  { %v100_v17 = vadd.f32 1.0, %v354_v16 }
  0xde   :  { %355 = vrcp.f32 %v100_v17 }
  0xeb   :  { %v356_v18 = vpop.eup %355 }
  0xec   :  { %v103_v19 = vpack.c.bf16 %v356_v18, %v356_v18 }
  0xee   :  { %331 = vmatmul.mubr.msk.bf16.vlgmr.msra.gmra.mxu1 %vm143_vm2, %v103_v19 }
 0x1ae   :  { %v181_v23 = vpop.f32.mrf.mxu1 }
 0x1af   :  { %v182_v24 = vadd.f32 %v292_v22, %v181_v23 }
 0x1b0   :  { %v332_v25 = vpop.f32.mrf.mxu1 }
 0x1b1   :  { %v298_v26 = vmul.f32 -1.442695, %v182_v24 }
 0x1b2   :  { %v184_v27 = vpop.f32.mrf.mxu1 }
 0x1b3   :  { %357 = vpow2.f32 %v298_v26 }
 0x1b4   :  { %v333_v28 = vpop.f32.mrf.mxu1 }
 0x1c0   :  { %v358_v29 = vpop.eup %357 }
 0x1c1   :  { %v190_v30 = vadd.f32 1.0, %v358_v29 }
 0x1c3   :  { %359 = vrcp.f32 %v190_v30 }
 0x1d0   :  { %v360_v31 = vpop.eup %359 }
 0x1d1   :  { %v193_v32 = vpack.c.bf16 %v360_v31, %v360_v31 }
 0x1d3   :  { %339 = vmatmul.mubr.msk.bf16.vlgmr.msra.gmra.mxu0 %vm53_vm1, %v193_v32 }
 0x293   :  { %v254_v34 = vpop.f32.mrf.mxu0 }
 0x294   :  { %v255_v35 = vadd.f32 %v299_v33, %v254_v34 }
 0x295   :  { %v340_v36 = vpop.f32.mrf.mxu0 }
 0x296   :  { %v261_v37 = vsel %vm260_vm3, %v255_v35, -inf }
 0x297   :  { %262 = vmax.xlane.f32.xlu0 %v261_v37  ;;  %v257_v38 = vpop.f32.mrf.mxu0 }
 0x299   :  { %v341_v39 = vpop.f32.mrf.mxu0 }
 0x320   :  { %v263_v40 = vpop.xlane.xlu0 %262 }
 0x321   :  { %v264_v41 = vsub.f32 %v255_v35, %v263_v40 }
 0x323   :  { %v265_v42 = vmul.f32 1.442695, %v264_v41 }
 0x325   :  { %361 = vpow2.f32 %v265_v42 }
 0x332   :  { %v362_v43 = vpop.eup %361 }
 0x333   :  { %v267_v44 = vsel %vm260_vm3, %v362_v43, 0.0 }
 0x334   :  { %268 = vadd.xlane.f32.xlu0 %v267_v44 }
 0x3bd   :  { %v269_v45 = vpop.xlane.xlu0 %268 }
 0x3be   :  { %363 = vrcp.f32 %v269_v45 }
 0x3cb   :  { %v364_v46 = vpop.eup %363 }
 0x3cc   :  { %v271_v47 = vmul.f32 %v364_v46, %v362_v43 }
 0x3ce   :  { %272 = vst.msk [vmem:[#allocation2] sm:$0xff] %vm260_vm3, %v271_v47 }
 0x3cf   :  { %376 = shalt.err (!%p373_p4)
}
 0x3d0   :  { %282 = dma.vmem_to_hbm [thread:$0]  %s280_s6, 128, %s481_s7, [#allocation3]  }
 0x3d1   :  { %385 = dma.done.wait [#allocation3], 128  }
 0x3d2   :  { %386 = vsyncadd [#allocation3], 4294967168 }
 0x3d3   :  { %286 = vsyncpa [#allocation3], 1 }

</bundles_post_ra>
